<compile_context>
chip_gen: v5e
topology: v5e:2x2
jax: 0.10.0
libtpu: 0.0.40
codegen_flags: <defaults>
</compile_context>

<pallas_src>
import jax
import jax.numpy as jnp
from jax.experimental import pallas as pl
from jax.experimental.pallas import tpu as pltpu


def _se_kernel(x_ref, w1_ref, s1_ref, b1_ref, w2_ref, s2_ref, b2_ref, o_ref):
    # AdaptiveAvgPool2d(1): accumulate in f32 along the lane (spatial) axis
    # without keeping a full f32 copy of the tile live.
    pooled = jnp.mean(x_ref[...], axis=-1, dtype=jnp.float32)              # (bb, C)

    # Squeeze: 1x1 conv (C -> Cr, no bias) + folded BN + ReLU.
    h = jnp.dot(pooled, w1_ref[...], preferred_element_type=jnp.float32)   # (bb, Cr)
    h = jnp.maximum(h * s1_ref[...] + b1_ref[...], 0.0)

    # Excite: 1x1 conv (Cr -> C, no bias) + folded BN + hsigmoid.
    y = jnp.dot(h, w2_ref[...], preferred_element_type=jnp.float32)        # (bb, C)
    y = y * s2_ref[...] + b2_ref[...]
    gate = (jnp.clip(y + 3.0, 0.0, 6.0) * (1.0 / 6.0)).astype(o_ref.dtype)

    # Re-read the VMEM-resident tile (so it is not pinned across the matmuls)
    # and scale by the per-channel gate in x's native dtype.
    o_ref[...] = x_ref[...] * gate[:, :, None]


def _vmem_budget_and_cap():
    """Per-chip tile budget + physical VMEM cap (v7x: 64 MiB/TC, v5e/v6e: 128 MiB)."""
    cap = None
    try:
        cap = getattr(pltpu.get_tpu_info(), "vmem_capacity_bytes", None)
    except Exception:
        cap = None
    if not cap:
        return 48 << 20, 64 << 20                       # conservative fallback
    cap = int(cap)
    budget = max(16 << 20, cap - (24 << 20))            # headroom for weights/scratch
    return budget, cap


def _choose_batch_block(B, C, HW, itemsize, budget_bytes):
    """Largest batch block whose double-buffered in+out tiles fit the budget,
    capped so the parallel grid keeps >= ~4 steps (megacore / pipelining)."""
    per_batch = 4 * C * HW * itemsize                   # in + out, double-buffered
    bb_vmem = max(1, budget_bytes // per_batch)
    bb_steps = max(1, -(-B // 4))                       # ceil(B / 4)
    return int(max(1, min(bb_vmem, bb_steps, B)))


def se_module(x, w1, s1, b1, w2, s2, b2, *, vmem_budget_bytes=None):
    """x: (B, C, H, W).  w1: (C, Cr), w2: (Cr, C), s*/b*: folded BN affine."""
    B, C, H, W = x.shape
    Cr = w1.shape[1]
    HW = H * W

    x_flat = x.reshape(B, C, HW)

    w1 = w1.astype(jnp.float32)
    w2 = w2.astype(jnp.float32)
    s1 = s1.reshape(1, Cr).astype(jnp.float32)
    b1 = b1.reshape(1, Cr).astype(jnp.float32)
    s2 = s2.reshape(1, C).astype(jnp.float32)
    b2 = b2.reshape(1, C).astype(jnp.float32)

    budget, cap = _vmem_budget_and_cap()
    if vmem_budget_bytes is not None:
        budget = vmem_budget_bytes

    itemsize = jnp.dtype(x.dtype).itemsize
    bb = _choose_batch_block(B, C, HW, itemsize, budget)
    grid = (pl.cdiv(B, bb),)
    # TODO(synk): for B == 1 (or a single (1, C, HW) slab exceeding the VMEM
    # budget) a two-pass HW-tiled variant (pass 1: pooled sums, pass 2: apply
    # gate) would let both v7x TensorCores participate; not needed here.

    tile_bytes = bb * C * HW * itemsize
    weight_bytes = (C * Cr + Cr * C + 2 * (Cr + C)) * 4
    vmem_limit = 4 * tile_bytes + 2 * weight_bytes + (8 << 20)
    vmem_limit = int(min(max(vmem_limit, 32 << 20), cap))

    cost = pl.CostEstimate(
        flops=int(2 * B * C * HW + 4 * B * C * Cr),
        transcendentals=0,
        bytes_accessed=int(2 * B * C * HW * itemsize + weight_bytes),
    )

    out = pl.pallas_call(
        _se_kernel,
        out_shape=jax.ShapeDtypeStruct((B, C, HW), x.dtype),
        grid_spec=pltpu.PrefetchScalarGridSpec(
            num_scalar_prefetch=0,
            grid=grid,
            in_specs=[
                pl.BlockSpec((bb, C, HW), lambda b: (b, 0, 0)),   # x
                pl.BlockSpec((C, Cr), lambda b: (0, 0)),          # w1 (C -> Cr)
                pl.BlockSpec((1, Cr), lambda b: (0, 0)),          # bn1 scale
                pl.BlockSpec((1, Cr), lambda b: (0, 0)),          # bn1 bias
                pl.BlockSpec((Cr, C), lambda b: (0, 0)),          # w2 (Cr -> C)
                pl.BlockSpec((1, C), lambda b: (0, 0)),           # bn2 scale
                pl.BlockSpec((1, C), lambda b: (0, 0)),           # bn2 bias
            ],
            out_specs=pl.BlockSpec((bb, C, HW), lambda b: (b, 0, 0)),
        ),
        compiler_params=pltpu.CompilerParams(
            dimension_semantics=("parallel",),
            vmem_limit_bytes=vmem_limit,
        ),
        cost_estimate=cost,
    )(x_flat, w1, s1, b1, w2, s2, b2)

    return out.reshape(B, C, H, W)


def fold_bn(gamma, beta, mean, var, eps=1e-5):
    scale = gamma / jnp.sqrt(var + eps)
    bias = beta - mean * scale
    return scale, bias


def se_reference(x, w1, s1, b1, w2, s2, b2):
    """Pure-JAX reference matching the PyTorch forward (eval-mode BN)."""
    pooled = jnp.mean(x, axis=(2, 3))                    # (B, C)
    h = pooled @ w1                                      # (B, Cr)
    h = jnp.maximum(h * s1 + b1, 0.0)
    y = h @ w2                                           # (B, C)
    y = y * s2 + b2
    gate = jnp.clip(y + 3.0, 0.0, 6.0) / 6.0
    return x * gate[:, :, None, None]


if __name__ == "__main__":
    B, C = 2, 16
    reduction = 4
    Cr = C // reduction

    key = jax.random.PRNGKey(0)
    (k_x, k_x2, k_x3, k_w1, k_w2, k_g1, k_b1, k_g2, k_b2,
     k_m1, k_v1, k_m2, k_v2) = jax.random.split(key, 13)

    # Conv weights: PyTorch Conv2d weight is (out, in, 1, 1); we store the
    # transposed (in, out) matmul form.
    w1 = jax.random.normal(k_w1, (C, Cr), dtype=jnp.float32) * 0.1   # C -> Cr
    w2 = jax.random.normal(k_w2, (Cr, C), dtype=jnp.float32) * 0.1   # Cr -> C

    # BatchNorm parameters (deterministic synthetic init), eval-mode stats.
    gamma1 = 1.0 + 0.1 * jax.random.normal(k_g1, (Cr,), dtype=jnp.float32)
    beta1 = 0.1 * jax.random.normal(k_b1, (Cr,), dtype=jnp.float32)
    mean1 = 0.1 * jax.random.normal(k_m1, (Cr,), dtype=jnp.float32)
    var1 = 0.5 + jax.random.uniform(k_v1, (Cr,), dtype=jnp.float32)

    gamma2 = 1.0 + 0.1 * jax.random.normal(k_g2, (C,), dtype=jnp.float32)
    beta2 = 0.1 * jax.random.normal(k_b2, (C,), dtype=jnp.float32)
    mean2 = 0.1 * jax.random.normal(k_m2, (C,), dtype=jnp.float32)
    var2 = 0.5 + jax.random.uniform(k_v2, (C,), dtype=jnp.float32)

    s1, b1 = fold_bn(gamma1, beta1, mean1, var1)
    s2, b2 = fold_bn(gamma2, beta2, mean2, var2)

    # Case 1: HW a multiple of 128 (16x16) — fully lane-aligned stores.
    x = jax.random.normal(k_x, (B, C, 16, 16), dtype=jnp.float32)
    out = jax.block_until_ready(se_module(x, w1, s1, b1, w2, s2, b2))
    ref = se_reference(x, w1, s1, b1, w2, s2, b2)
    assert out.shape == x.shape
    assert jnp.allclose(out, ref, atol=1e-5, rtol=1e-5), "mismatch (16x16)"

    # Case 2: HW = 49 (7x7) — lane-partial (masked) stores, no HBM padding.
    x2 = jax.random.normal(k_x2, (B, C, 7, 7), dtype=jnp.float32)
    out2 = jax.block_until_ready(se_module(x2, w1, s1, b1, w2, s2, b2))
    ref2 = se_reference(x2, w1, s1, b1, w2, s2, b2)
    assert out2.shape == x2.shape
    assert jnp.allclose(out2, ref2, atol=1e-5, rtol=1e-5), "mismatch (7x7)"

    # Case 3: B = 10 — exercises the ragged (cdiv) last batch block.
    x3 = jax.random.normal(k_x3, (10, C, 7, 7), dtype=jnp.float32)
    out3 = jax.block_until_ready(se_module(x3, w1, s1, b1, w2, s2, b2))
    ref3 = se_reference(x3, w1, s1, b1, w2, s2, b2)
    assert out3.shape == x3.shape
    assert jnp.allclose(out3, ref3, atol=1e-5, rtol=1e-5), "mismatch (ragged B=10)"

    print("KERNEL_OK")
</pallas_src>

<mosaic_0001>
module attributes {stable_mosaic.version = 11 : i64} {
  func.func @_se_kernel(%arg0: i32, %arg1: memref<1x16x256xf32, #tpu.memory_space<vmem>>, %arg2: memref<16x4xf32, #tpu.memory_space<vmem>>, %arg3: memref<1x4xf32, #tpu.memory_space<vmem>>, %arg4: memref<1x4xf32, #tpu.memory_space<vmem>>, %arg5: memref<4x16xf32, #tpu.memory_space<vmem>>, %arg6: memref<1x16xf32, #tpu.memory_space<vmem>>, %arg7: memref<1x16xf32, #tpu.memory_space<vmem>>, %arg8: memref<1x16x256xf32, #tpu.memory_space<vmem>>) attributes {dimension_semantics = [#tpu.dimension_semantics<parallel>], iteration_bounds = array<i64: 2>, scalar_prefetch = 0 : i64, scratch_operands = 0 : i64, tpu.core_type = #tpu.core_type<tc>, window_params = [{transform_indices = @transform_0, window_bounds = array<i64: 1, 16, 256>}, {pipeline_mode = #tpu.pipeline_mode<synchronous>, transform_indices = @transform_1, window_bounds = array<i64: 16, 4>}, {pipeline_mode = #tpu.pipeline_mode<synchronous>, transform_indices = @transform_2, window_bounds = array<i64: 1, 4>}, {pipeline_mode = #tpu.pipeline_mode<synchronous>, transform_indices = @transform_3, window_bounds = array<i64: 1, 4>}, {pipeline_mode = #tpu.pipeline_mode<synchronous>, transform_indices = @transform_4, window_bounds = array<i64: 4, 16>}, {pipeline_mode = #tpu.pipeline_mode<synchronous>, transform_indices = @transform_5, window_bounds = array<i64: 1, 16>}, {pipeline_mode = #tpu.pipeline_mode<synchronous>, transform_indices = @transform_6, window_bounds = array<i64: 1, 16>}, {transform_indices = @transform_7, window_bounds = array<i64: 1, 16, 256>}]} {
    %c0 = arith.constant 0 : index
    %c0_0 = arith.constant 0 : index
    %c0_1 = arith.constant 0 : index
    %0 = vector.load %arg1[%c0, %c0_0, %c0_1] : memref<1x16x256xf32, #tpu.memory_space<vmem>>, vector<1x16x256xf32>
    %cst = arith.constant dense<0.000000e+00> : vector<1x16xf32>
    %1 = vector.multi_reduction <add>, %0, %cst [2] : vector<1x16x256xf32> to vector<1x16xf32>
    %cst_2 = arith.constant 2.560000e+02 : f32
    %2 = vector.broadcast %cst_2 : f32 to vector<1x16xf32>
    %3 = arith.divf %1, %2 : vector<1x16xf32>
    %c0_3 = arith.constant 0 : index
    %c0_4 = arith.constant 0 : index
    %4 = vector.load %arg2[%c0_3, %c0_4] : memref<16x4xf32, #tpu.memory_space<vmem>>, vector<16x4xf32>
    %cst_5 = arith.constant dense<0.000000e+00> : vector<1x4xf32>
    %5 = tpu.matmul %3, %4, %cst_5 {dimension_numbers = #tpu.dot_dimension_numbers<[1], [0], [0], [1], [0, 0, 1, 1], [], []>} : vector<1x16xf32>, vector<16x4xf32>, vector<1x4xf32> -> vector<1x4xf32>
    %c0_6 = arith.constant 0 : index
    %c0_7 = arith.constant 0 : index
    %6 = vector.load %arg3[%c0_6, %c0_7] : memref<1x4xf32, #tpu.memory_space<vmem>>, vector<1x4xf32>
    %7 = arith.mulf %5, %6 : vector<1x4xf32>
    %c0_8 = arith.constant 0 : index
    %c0_9 = arith.constant 0 : index
    %8 = vector.load %arg4[%c0_8, %c0_9] : memref<1x4xf32, #tpu.memory_space<vmem>>, vector<1x4xf32>
    %9 = arith.addf %7, %8 : vector<1x4xf32>
    %cst_10 = arith.constant 0.000000e+00 : f32
    %10 = vector.broadcast %cst_10 : f32 to vector<1x4xf32>
    %11 = arith.maximumf %9, %10 : vector<1x4xf32>
    %c0_11 = arith.constant 0 : index
    %c0_12 = arith.constant 0 : index
    %12 = vector.load %arg5[%c0_11, %c0_12] : memref<4x16xf32, #tpu.memory_space<vmem>>, vector<4x16xf32>
    %cst_13 = arith.constant dense<0.000000e+00> : vector<1x16xf32>
    %13 = tpu.matmul %11, %12, %cst_13 {dimension_numbers = #tpu.dot_dimension_numbers<[1], [0], [0], [1], [0, 0, 1, 1], [], []>} : vector<1x4xf32>, vector<4x16xf32>, vector<1x16xf32> -> vector<1x16xf32>
    %c0_14 = arith.constant 0 : index
    %c0_15 = arith.constant 0 : index
    %14 = vector.load %arg6[%c0_14, %c0_15] : memref<1x16xf32, #tpu.memory_space<vmem>>, vector<1x16xf32>
    %15 = arith.mulf %13, %14 : vector<1x16xf32>
    %c0_16 = arith.constant 0 : index
    %c0_17 = arith.constant 0 : index
    %16 = vector.load %arg7[%c0_16, %c0_17] : memref<1x16xf32, #tpu.memory_space<vmem>>, vector<1x16xf32>
    %17 = arith.addf %15, %16 : vector<1x16xf32>
    %cst_18 = arith.constant 3.000000e+00 : f32
    %18 = vector.broadcast %cst_18 : f32 to vector<1x16xf32>
    %19 = arith.addf %17, %18 : vector<1x16xf32>
    %cst_19 = arith.constant 0.000000e+00 : f32
    %cst_20 = arith.constant 6.000000e+00 : f32
    %20 = vector.broadcast %cst_19 : f32 to vector<1x16xf32>
    %21 = arith.maximumf %20, %19 : vector<1x16xf32>
    %22 = vector.broadcast %cst_20 : f32 to vector<1x16xf32>
    %23 = arith.minimumf %22, %21 : vector<1x16xf32>
    %cst_21 = arith.constant 0.166666672 : f32
    %24 = vector.broadcast %cst_21 : f32 to vector<1x16xf32>
    %25 = arith.mulf %23, %24 : vector<1x16xf32>
    %c0_22 = arith.constant 0 : index
    %c0_23 = arith.constant 0 : index
    %c0_24 = arith.constant 0 : index
    %26 = vector.load %arg1[%c0_22, %c0_23, %c0_24] : memref<1x16x256xf32, #tpu.memory_space<vmem>>, vector<1x16x256xf32>
    %27 = vector.shape_cast %25 : vector<1x16xf32> to vector<1x16x1xf32>
    %28 = vector.broadcast %27 : vector<1x16x1xf32> to vector<1x16x256xf32>
    %29 = arith.mulf %26, %28 : vector<1x16x256xf32>
    %c0_25 = arith.constant 0 : index
    %c0_26 = arith.constant 0 : index
    %c0_27 = arith.constant 0 : index
    %30 = vector.load %arg8[%c0_25, %c0_26, %c0_27] : memref<1x16x256xf32, #tpu.memory_space<vmem>>, vector<1x16x256xf32>
    tpu.vector_store %arg8[%c0_25, %c0_26, %c0_27], %29 {strides = array<i32>} : memref<1x16x256xf32, #tpu.memory_space<vmem>>, vector<1x16x256xf32>,
    return
  }
  func.func @transform_0(%arg0: i32) -> (i32, i32, i32) {
    %c0_i32 = arith.constant 0 : i32
    %c0_i32_0 = arith.constant 0 : i32
    %c0_i32_1 = arith.constant 0 : i32
    return %arg0, %c0_i32, %c0_i32_0 : i32, i32, i32
  }
  func.func @transform_1(%arg0: i32) -> (i32, i32) {
    %c0_i32 = arith.constant 0 : i32
    %c0_i32_0 = arith.constant 0 : i32
    %c0_i32_1 = arith.constant 0 : i32
    return %c0_i32, %c0_i32_0 : i32, i32
  }
  func.func @transform_2(%arg0: i32) -> (i32, i32) {
    %c0_i32 = arith.constant 0 : i32
    %c0_i32_0 = arith.constant 0 : i32
    %c0_i32_1 = arith.constant 0 : i32
    return %c0_i32, %c0_i32_0 : i32, i32
  }
  func.func @transform_3(%arg0: i32) -> (i32, i32) {
    %c0_i32 = arith.constant 0 : i32
    %c0_i32_0 = arith.constant 0 : i32
    %c0_i32_1 = arith.constant 0 : i32
    return %c0_i32, %c0_i32_0 : i32, i32
  }
  func.func @transform_4(%arg0: i32) -> (i32, i32) {
    %c0_i32 = arith.constant 0 : i32
    %c0_i32_0 = arith.constant 0 : i32
    %c0_i32_1 = arith.constant 0 : i32
    return %c0_i32, %c0_i32_0 : i32, i32
  }
  func.func @transform_5(%arg0: i32) -> (i32, i32) {
    %c0_i32 = arith.constant 0 : i32
    %c0_i32_0 = arith.constant 0 : i32
    %c0_i32_1 = arith.constant 0 : i32
    return %c0_i32, %c0_i32_0 : i32, i32
  }
  func.func @transform_6(%arg0: i32) -> (i32, i32) {
    %c0_i32 = arith.constant 0 : i32
    %c0_i32_0 = arith.constant 0 : i32
    %c0_i32_1 = arith.constant 0 : i32
    return %c0_i32, %c0_i32_0 : i32, i32
  }
  func.func @transform_7(%arg0: i32) -> (i32, i32, i32) {
    %c0_i32 = arith.constant 0 : i32
    %c0_i32_0 = arith.constant 0 : i32
    %c0_i32_1 = arith.constant 0 : i32
    return %arg0, %c0_i32, %c0_i32_0 : i32, i32, i32
  }
}

</mosaic_0001>

<bundles_post_ra>
// kernel: tpu_custom_call.1
= control target key start
LH: loop header
LB: loop body
LE: loop exit
PB: predicated region body
PF: predicated region fallthrough
CT: control target
= control target key end

     0   :  { %12 = vsyncpa [#allocation3], 0  ;;  %s890_s0 = inlined_call_operand.hbm [shape: f32[2,16,256], index: 0, kind: input, shape index: {}]   ;;  %s891_s1 = inlined_call_operand.vmem [shape: f32[16,4], index: 1, kind: input, shape index: {}]   ;;  %s892_s2 = inlined_call_operand.vmem [shape: f32[1,4], index: 2, kind: input, shape index: {}]   ;;  %s893_s3 = inlined_call_operand.vmem [shape: f32[1,4], index: 3, kind: input, shape index: {}]   ;;  %s894_s4 = inlined_call_operand.vmem [shape: f32[4,16], index: 4, kind: input, shape index: {}]   ;;  %s895_s5 = inlined_call_operand.vmem [shape: f32[1,16], index: 5, kind: input, shape index: {}]   ;;  %s896_s6 = inlined_call_operand.vmem [shape: f32[1,16], index: 6, kind: input, shape index: {}]   ;;  %s897_s7 = inlined_call_operand.hbm [shape: f32[2,16,256], index: 7, kind: output, shape index: {}]  }
   0x1   :  { %14 = vsyncpa [#allocation3 + $0x1], 0 }
   0x2   :  { %15 = vsyncpa [#allocation4], 0 }
   0x3   :  { %17 = vsyncpa [#allocation4 + $0x1], 0  ;;  %s722_s24 = smov 0   ;;  %s724_s25 = smov 0  }
   0x4   :  { %s726_s26 = smov 0   ;;  %s728_s27 = smov 0  }
   0x5 LB: > { %s743_s28 = sadd.s32 4294967295, %s675_s27   ;;  %s504_s29 = sadd.s32 4294967294, %s675_s27   ;;  %s675_s27 = sphi %s728_s27, %s909_s27   ;;  %s671_s26 = sphi %s726_s26, %s908_s26   ;;  %s667_s25 = sphi %s724_s25, %s907_s25   ;;  %s663_s24 = sphi %s722_s24, %s906_s24  }
   0x6   : > { %s747_s30 = sadd.s32 1, %s675_s27   ;;  %s30_s8 = sadd.s32 1, %s671_s26 }
   0x7   : > { %s27_s9 = ssub.s32 %s675_s27, %s747_s30  ;;  %p37_p0 = scmp.ne.s32.totalorder %s671_s26, %s667_s25 }
   0x8   : > { %p28_p1 = scmp.eq.s32.totalorder %s27_s9, 0  ;;  %p38_p2 = scmp.eq.s32.totalorder %s675_s27, 0 }
   0x9   : > { %p43_p3 = scmp.ne.s32.totalorder %s667_s25, %s663_s24  ;;  %p44_p4 = scmp.eq.s32.totalorder %s743_s28, 0 }
   0xa   : > { %s759_s10 = scalar_select %p28_p1, %s671_s26, %s30_s8  }
   0xb   : > { %p761_p5 = por %p38_p2, %p37_p0  ;;  %p765_p6 = por %p44_p4, %p43_p3 }
   0xc   : > { %898 = sst [smem:[#allocation8_spill]] %s759_s10  ;;  %p193_p7 = scmp.eq.s32.totalorder %s743_s28, 1 }
   0xd   : > { %p199_p8 = scmp.eq.s32.totalorder %s504_s29, 1  ;;  %p535_p10 = scmp.lt.s32.totalorder %s675_s27, 2 }
   0xe   : > { %p772_p11 = por %p193_p7, %p37_p0  ;;  %s237_s15 = sand.u32 1, %s671_s26  }
   0xf   : > { %p776_p12 = por %p199_p8, %p43_p3  ;;  %s521_s16 = sshll.u32 %s675_s27, 5 }
  0x10   : > { %s507_s17 = sshll.u32 %s237_s15, 5  ;;  %s246_s20 = scalar_lea.hbm %s890_s0, %s521_s16 }
  0x11   : > { %s247_s21 = sshll.u32 %s246_s20, 4  ;;  %s241_s22 = scalar_lea.vmem [#allocation2], %s507_s17  ;;  %s248_s21 = int_to_ptr.hbm [resolvable:$true] %s247_s21 }
  0x12   : > { %s249_s23 = sshll.u32 %s241_s22, 4  ;;  %p787_p13 = pnand %p535_p10, %p761_p5  ;;  %s250_s23 = int_to_ptr.vmem [resolvable:$true] %s249_s23 }
  0x13   : > { %p510_p0 = scmp.ge.s32.totalorder %s675_s27, 1  ;;  %p257_p1 = scmp.lt.s32.totalorder %s675_s27, 3 }
  0x14   : > { %s238_s8 = scalar_lea.sflag [#allocation3], %s237_s15  ;;  %s579_s9 = sshra.s32 %s248_s21, 4  ;;  %s580_s9 = int_to_ptr.hbm [resolvable:$true] %s579_s9 }
  0x15   : > { %s581_s10 = scalar_lea.hbm %s580_s9, 32  ;;  %p583_p3 = pneg %p787_p13 }
  0x16   : > { %p582_p2 = scmp.ne.s32.totalorder %s580_s9, %s581_s10  ;;  %s586_s11 = scalar_lea.hbm %s890_s0, 64 }
  0x17   : > { %p587_p5 = scmp.lt.s32.totalorder %s580_s9, %s890_s0  ;;  %p588_p8 = scmp.lt.s32.totalorder %s586_s11, %s581_s10 }
  0x18   : > { %p584_p4 = pnand %p583_p3, %p582_p2 }
  0x19   : > { %p589_p10 = por %p588_p8, %p587_p5 }
  0x1a   : > { %p585_p7 = pneg %p584_p4 }
  0x1c   : > { %p590_p9 = pnand %p589_p10, %p585_p7 }
  0x1e   : > { %593 = shalt.err (!%p590_p9)
}
  0x1f   : > { %s677_s15 = smov 256   ;;  %s678_s20 = smov 16  }
  0x20   : > { %530 = dma.hbm_to_vmem [thread:$0]  (!%p787_p13), %s248_s21, 512, %s250_s23, %s238_s8, %s677_s15, %s677_s15, %s678_s20  }
  0x21   : > { %p258_p2 = pnand %p510_p0, %p257_p1 }
  0x22   : > { %s808_s22 = sand.u32 (!%p258_p2), 1, %s667_s25  }
  0x23   : > { %261 = sbr.rel (%p258_p2) target bundleno = 583 (0x247), region = 48  ;;  %s511_s10 = sshll.u32 (!%p258_p2), %s808_s22, 5 }
  0x24   : > { %s264_s9 = scalar_lea.sflag (!%p258_p2), [#allocation3], %s808_s22  ;;  %s267_s16 = scalar_lea.vmem (!%p258_p2), [#allocation2], %s511_s10 }
  0x28   : > { %654 = dma.done.wait (%p765_p6), %s264_s9, 512  }
  0x29   : > { %656 = vsyncadd (%p765_p6), %s264_s9, 4294966784  ;;  %v818_v0 = vld [vmem:[%s267_s16] sm:$0xff]  ;;  %v820_v1 = vld [vmem:[%s267_s16 + $0x8] sm:$0xff]  ;;  %v679_v7 = vmov 256.0   ;;  %v322_v15 = vlaneseq  ;;  %vm327_vm1 = vcmask 130112   ;;  %vm329_vm2 = vcmask 130048  }
  0x2a   : > { %v303_v2 = vadd.f32 %v820_v1, %v818_v0  ;;  %v824_v3 = vld [vmem:[%s267_s16 + $0x10] sm:$0xff]  ;;  %v826_v4 = vld [vmem:[%s267_s16 + $0x18] sm:$0xff]  ;;  %v319_v6 = vld [vmem:[%s891_s1 + $0x8] sm:$0xff]  ;;  %577 = vrcp.f32 %v679_v7  ;;  %vm362_vm3 = vcmask 1043456   ;;  %vm358_vm4 = vcmask 31744   ;;  %s298_s23 = scalar_lea.vmem [#allocation5], %s511_s10 }
  0x2b   : > { %v306_v5 = vadd.f32 %v826_v4, %v824_v3  ;;  %346 = vmatpush.msra.mxu0 %v319_v6  ;;  %v318_v8 = vld [vmem:[%s891_s1] sm:$0xff]  ;;  %v323_v17 = vand.u32 127, %v322_v15  ;;  %v396_v32 = vshrl.u32 %v322_v15, 7  ;;  %s522_s12 = sshll.u32 %s743_s28, 5  ;;  %s428_s11 = sshll.u32 %s298_s23, 4  ;;  %s429_s11 = int_to_ptr.vmem [resolvable:$true] %s428_s11 }
  0x2c   : > { %304 = vadd.xlane.f32.xlu0 %v303_v2  ;;  %v357_v25 = vld [vmem:[%s894_s4] sm:$0xf]  ;;  %s427_s17 = scalar_lea.hbm %s897_s7, %s522_s12  ;;  %s416_s10 = scalar_lea.sflag [#allocation4], %s808_s22 }
  0x2d   : > { %347 = vmatpush.msra.mxu0 %v318_v8  ;;  %v325_v19 = vadd.s32 4294967288, %v323_v17  ;;  %514 = vmatpush.msk.msra.mxu1 %vm362_vm3, %v357_v25  ;;  %v352_v26 = vld [vmem:[%s892_s2] sm:$0x1]  ;;  %v403_v33 = vadd.s32 8, %v396_v32  ;;  %s430_s18 = sshll.u32 %s427_s17, 4  ;;  %s629_s9 = scalar_lea.hbm %s897_s7, 64  ;;  %s431_s18 = int_to_ptr.hbm [resolvable:$true] %s430_s18 }
  0x2e   : > { %v354_v28 = vld [vmem:[%s893_s3] sm:$0x1]  ;;  %574 = vset.pattern.permute.xlu1 %v396_v32  ;;  %s623_s19 = sshra.s32 %s431_s18, 4  ;;  %s624_s19 = int_to_ptr.hbm [resolvable:$true] %s623_s19 }
  0x2f   : > { %576 = vset.pattern.permute.xlu0 %v403_v33  ;;  %v386_v34 = vld [vmem:[%s895_s5] sm:$0x1]  ;;  %s625_s28 = scalar_lea.hbm %s624_s19, 32  ;;  %p630_p0 = scmp.lt.s32.totalorder %s624_s19, %s897_s7 }
  0x30   : > { %v578_v9 = vpop.eup %577  ;;  %v388_v36 = vld [vmem:[%s896_s6] sm:$0x1]  ;;  %p626_p6 = scmp.ne.s32.totalorder %s624_s19, %s625_s28  ;;  %p631_p1 = scmp.lt.s32.totalorder %s629_s9, %s625_s28 }
  0x31   : > { %v310_v10 = vmul.f32 256.0, %v578_v9  ;;  %vm314_vm0 = vweird.f32 %v578_v9 }
  0x32   : > { %p627_p9 = pnand %p626_p6, %p772_p11  ;;  %p632_p3 = por %p631_p1, %p630_p0 }
  0x33   : > { %v311_v11 = vsub.f32 1.0, %v310_v10 }
  0x34   : > { %307 = vadd.xlane.f32.xlu0 %v306_v5  ;;  %p628_p13 = pneg %p627_p9 }
  0x35   : > { %v312_v12 = vmul.f32 %v578_v9, %v311_v11 }
  0x36   : > { %p633_p4 = pnand %p632_p3, %p628_p13 }
  0x37   : > { %v313_v13 = vadd.f32 %v578_v9, %v312_v12 }
  0x39   : > { %v315_v16 = vsel %vm314_vm0, %v578_v9, %v313_v13 }
  0x9f   : > { %v305_v14 = vpop.xlane.xlu0 %304 }
  0xa0   : > { %v316_v18 = vmul.f32 %v315_v16, %v305_v14 }
  0xa2   : > { %v324_v22 = vperm.slane %v316_v18, %v323_v17 }
  0xa7   : > { %v308_v20 = vpop.xlane.xlu0 %307 }
  0xa8   : > { %v317_v21 = vmul.f32 %v315_v16, %v308_v20 }
  0xaa   : > { %v326_v23 = vperm.slane %v317_v21, %v325_v19 }
  0xac   : > { %v328_v24 = vsel %vm327_vm1, %v326_v23, %v324_v22 }
  0xad   : > { %513 = vmatmul.msk.f32.vlgmr.msra.gmra.mxu0 %vm329_vm2, %v328_v24 }
 0x12a   : > { %v349_v27 = vpop.f32.mrf.mxu0 }
 0x12b   : > { %v353_v29 = vmul.f32 %v352_v26, %v349_v27 }
 0x12d   : > { %v355_v30 = vadd.f32 %v354_v28, %v353_v29 }
 0x12f   : > { %v356_v31 = vmax.f32 %v355_v30, 0.0 }
 0x131   : > { %515 = vmatmul.msk.f32.vlgmr.msra.gmra.mxu1 %vm358_vm4, %v356_v31 }
 0x1ae   : > { %v383_v35 = vpop.f32.mrf.mxu1 }
 0x1af   : > { %v387_v37 = vmul.f32 %v386_v34, %v383_v35 }
 0x1b1   : > { %v389_v38 = vadd.f32 %v388_v36, %v387_v37 }
 0x1b3   : > { %v390_v39 = vadd.f32 3.0, %v389_v38 }
 0x1b5   : > { %v391_v40 = vmax.f32 %v390_v39, 0.0 }
 0x1b7   : > { %v392_v41 = vmin.f32 %v391_v40, 6.0 }
 0x1b9   : > { %v393_v42 = vmul.f32 0.16666667, %v392_v41 }
 0x1bb   : > { %v394_v43 = vperm.slane %v393_v42, 0 }
 0x1bd   : > { %399 = vperm.xlu1 %574, %v394_v43  }
 0x1c5   : > { %575 = vset.pattern.permute.xlu1 %v403_v33 }
 0x1cd   : > { %405 = vperm.xlu1 %575, %v394_v43  }
 0x22f   : > { %v400_v44 = vpop.permute.xlu1 %399 }
 0x230   : > { %v407_v45 = vmul.f32 %v400_v44, %v818_v0  ;;  %v408_v46 = vmul.f32 %v400_v44, %v820_v1 }
 0x232   : > { %411 = vst [vmem:[%s298_s23] sm:$0xff] %v407_v45 }
 0x233   : > { %412 = vst [vmem:[%s298_s23 + $0x8] sm:$0xff] %v408_v46 }
 0x23f   : > { %v406_v47 = vpop.permute.xlu1 %405 }
 0x240   : > { %v409_v48 = vmul.f32 %v406_v47, %v824_v3  ;;  %v410_v49 = vmul.f32 %v406_v47, %v826_v4 }
 0x242   : > { %413 = vst [vmem:[%s298_s23 + $0x10] sm:$0xff] %v409_v48 }
 0x243   : > { %414 = vst [vmem:[%s298_s23 + $0x18] sm:$0xff] %v410_v49 }
 0x244   : > { %636 = shalt.err (!%p633_p4)
}
 0x245   : > { %s680_s22 = smov 256   ;;  %s681_s23 = smov 16  }
 0x246   : > { %525 = dma.vmem_to_hbm [thread:$0]  (%p772_p11), %s429_s11, 512, %s431_s18, %s416_s10, %s680_s22, %s680_s22, %s681_s23  }
 0x247 PF: > { %s445_s12 = sand.u32 1, %s663_s24   ;;  %p904_p7 = scmp.ge.s32.totalorder %s675_s27, 2 }
 0x248   : > { %s446_s29 = scalar_lea.sflag [#allocation4], %s445_s12 }
 0x249   : > { %p532_p5 = pnand %p904_p7, %p776_p12 }
 0x24b   : > { %p533_p8 = pneg %p532_p5 }
 0x24d   : > { %658 = dma.done.wait (%p533_p8), %s446_s29, 512  }
 0x24e   : > { %660 = vsyncadd (%p533_p8), %s446_s29, 4294966784  ;;  %s905_s8 = sld [smem:[#allocation8_spill]]  ;;  %p20_p10 = scmp.ge.s32.totalorder %s747_s30, 4  }
 0x24f   : > { %s906_s24 = smov %s667_s25  ;;  %s907_s25 = smov %s671_s26 }
 0x250   : > { %s909_s27 = smov %s747_s30  ;;  %22 = sbr.rel (!%p20_p10) target bundleno = 5 (0x5), region = 93 }
 0x254   : > { %s908_s26 = smov %s905_s8 }
 0x255   :  { %452 = vsyncpa [#allocation3], 1 }
 0x256   :  { %454 = vsyncpa [#allocation3 + $0x1], 1 }
 0x257   :  { %455 = vsyncpa [#allocation4], 1 }
 0x258   :  { %457 = vsyncpa [#allocation4 + $0x1], 1 }

</bundles_post_ra>
